<compile_context>
chip_gen: v7x
topology: tpu7x:2x2x1
jax: 0.10.0
libtpu: 0.0.40
codegen_flags: <defaults>
</compile_context>

<pallas_src>
import jax
import jax.numpy as jnp
from jax.experimental import pallas as pl
from jax.experimental.pallas import tpu as pltpu


EPS = 1e-5
NEG_SLOPE = 0.01
DIM = 128          # every layer width padded to the 128-lane width
_N_VEC_ROWS = 24   # 20 packed vectors, padded up to a multiple of 8 sublanes

# Row indices into the packed (24, 128) bias/gamma/beta table.
_B1, _G1, _BE1 = 0, 1, 2
_B2, _G2, _BE2 = 3, 4, 5
_B3, _G3, _BE3 = 6, 7, 8
_B4 = 9
_B5, _G5, _BE5 = 10, 11, 12
_B6, _G6, _BE6 = 13, 14, 15
_B7, _G7, _BE7 = 16, 17, 18
_B8 = 19

_BN_LAYERS = (0, 1, 2, 4, 5, 6)  # fc indices (0-based) that have a BatchNorm


def ae_kernel(x_ref, w_ref, v_ref, xhat_ref, z_ref):
    x = x_ref[...]          # (B, 128), f32
    v = v_ref[...]          # (24, 128), f32 — loaded once

    def vec(i):             # (1, 128) row of the packed table (static index)
        return v[i:i + 1, :]

    def linear(h, wi, b_row):
        # bf16 MXU operands (weights pre-packed as bf16), f32 accumulation.
        # Bias add stays f32.
        return (
            jnp.dot(h.astype(jnp.bfloat16), w_ref[wi],
                    preferred_element_type=jnp.float32)
            + vec(b_row)
        )

    def bn_lrelu(h, g_row, be_row):
        # BatchNorm1d (training mode: batch mean, biased variance) with
        # two-pass variance for robustness; all statistics / normalization in
        # f32.  LeakyReLU(0.01) as a single max().
        mean = jnp.mean(h, axis=0, keepdims=True)
        d = h - mean
        var = jnp.mean(d * d, axis=0, keepdims=True)
        scale = vec(g_row) * jax.lax.rsqrt(var + EPS)      # rsqrt -> EUP slot
        hn = d * scale + vec(be_row)
        return jnp.maximum(hn, NEG_SLOPE * hn)

    # ---- encode ----
    h = bn_lrelu(linear(x, 0, _B1), _G1, _BE1)
    h = bn_lrelu(linear(h, 1, _B2), _G2, _BE2)
    h = bn_lrelu(linear(h, 2, _B3), _G3, _BE3)
    z = linear(h, 3, _B4)
    z_ref[...] = z.astype(z_ref.dtype)

    # ---- decode ----
    h = bn_lrelu(linear(z, 4, _B5), _G5, _BE5)
    h = bn_lrelu(linear(h, 5, _B6), _G6, _BE6)
    h = bn_lrelu(linear(h, 6, _B7), _G7, _BE7)
    out = linear(h, 7, _B8)
    xhat_ref[...] = jax.nn.sigmoid(out).astype(xhat_ref.dtype)


def _parse_params(params):
    """Flat list layout: per layer (w, b) plus (gamma, beta) for BN layers."""
    ws, bs, gs, bes = [], [], {}, {}
    idx = 0
    for layer in range(8):
        ws.append(params[idx])
        bs.append(params[idx + 1])
        idx += 2
        if layer in _BN_LAYERS:
            gs[layer] = params[idx]
            bes[layer] = params[idx + 1]
            idx += 2
    return ws, bs, gs, bes


def prepare_params(params):
    """One-time parameter packing — call OUTSIDE the per-step forward.

    Returns:
      w_packed: (8, 128, 128) bf16 — zero-padded weight tiles (MXU operands).
      vecs:     (24, 128) f32      — packed biases / gammas / betas.
    """
    ws, bs, gs, bes = _parse_params(params)

    w_packed = jnp.stack(
        [jnp.pad(jnp.asarray(w, jnp.float32),
                 ((0, DIM - w.shape[0]), (0, DIM - w.shape[1]))) for w in ws]
    ).astype(jnp.bfloat16)

    def row(a):
        a = jnp.asarray(a, jnp.float32).reshape(1, -1)
        return jnp.pad(a, ((0, 0), (0, DIM - a.shape[1])))

    rows = []
    for layer in range(8):
        rows.append(row(bs[layer]))
        if layer in _BN_LAYERS:
            rows.append(row(gs[layer]))
            rows.append(row(bes[layer]))
    vecs = jnp.concatenate(rows, axis=0)
    vecs = jnp.pad(vecs, ((0, _N_VEC_ROWS - vecs.shape[0]), (0, 0)))
    return w_packed, vecs


def ae_forward(x, w_packed, vecs):
    """Forward pass.  x: (B, in_dim) f32; w_packed/vecs from prepare_params().

    Returns 128-lane-padded outputs (no wrapper-side slice copies):
      xhat_p: (B, 128) f32 — x_hat in lanes [:in_dim] (padding lanes hold 0.5).
      z_p:    (B, 128) f32 — z     in lanes [:z_dim]  (padding lanes hold 0).
    """
    B, in_dim = x.shape
    assert in_dim <= DIM, "this kernel assumes all layer widths <= 128"

    # Only per-call wrapper op: lane-pad the input (zero weight rows make the
    # padded columns contribute nothing).
    x_pad = jnp.pad(x.astype(jnp.float32), ((0, 0), (0, DIM - in_dim)))

    vmem = pl.BlockSpec(memory_space=pltpu.MemorySpace.VMEM)
    xhat_p, z_p = pl.pallas_call(
        ae_kernel,
        out_shape=(
            jax.ShapeDtypeStruct((B, DIM), jnp.float32),
            jax.ShapeDtypeStruct((B, DIM), jnp.float32),
        ),
        in_specs=[vmem, vmem, vmem],
        out_specs=(vmem, vmem),
    )(x_pad, w_packed, vecs)
    return xhat_p, z_p


def init_params(key, in_dim, z_dim=32):
    """Deterministic synthetic parameters. Weights (in, out); biases/bn as (1, out)."""
    dims = [
        (in_dim, 128), (128, 128), (128, 64), (64, z_dim),   # fc1..fc4
        (z_dim, 64), (64, 128), (128, 128), (128, in_dim),   # fc5..fc8
    ]
    params = []
    keys = jax.random.split(key, len(dims) * 2)
    for i, (din, dout) in enumerate(dims):
        scale = 1.0 / jnp.sqrt(jnp.float32(din))
        w = jax.random.uniform(keys[2 * i], (din, dout), jnp.float32, -scale, scale)
        b = jax.random.uniform(keys[2 * i + 1], (1, dout), jnp.float32, -scale, scale)
        params.extend([w, b])
        if i in _BN_LAYERS:
            params.append(jnp.ones((1, dout), jnp.float32))   # gamma
            params.append(jnp.zeros((1, dout), jnp.float32))  # beta
    return params


def _ae_reference(x, params, matmul_dtype=jnp.float32):
    """Pure-JAX reference mirroring the PyTorch forward (training-mode BN).

    matmul_dtype=bf16 reproduces the kernel's MXU numerics (f32 accumulation).
    """
    ws, bs, gs, bes = _parse_params(params)

    def mm(h, w):
        return jnp.dot(h.astype(matmul_dtype), w.astype(matmul_dtype),
                       preferred_element_type=jnp.float32)

    def bn_lrelu(h, g, be):
        mean = jnp.mean(h, axis=0, keepdims=True)
        var = jnp.mean((h - mean) ** 2, axis=0, keepdims=True)
        hn = (h - mean) * jax.lax.rsqrt(var + EPS) * g + be
        return jnp.where(hn >= 0, hn, NEG_SLOPE * hn)

    h = x.astype(jnp.float32)
    for layer in range(3):
        h = bn_lrelu(mm(h, ws[layer]) + bs[layer], gs[layer], bes[layer])
    z = mm(h, ws[3]) + bs[3]
    h = z
    for layer in range(4, 7):
        h = bn_lrelu(mm(h, ws[layer]) + bs[layer], gs[layer], bes[layer])
    x_hat = jax.nn.sigmoid(mm(h, ws[7]) + bs[7])
    return x_hat, z


if __name__ == "__main__":
    in_dim = 64
    z_dim = 32
    batch = 8

    key = jax.random.PRNGKey(0)
    k_x, k_p = jax.random.split(key)
    x = jax.random.normal(k_x, (batch, in_dim), jnp.float32)
    params = init_params(k_p, in_dim, z_dim)

    # One-time packing, hoisted out of the per-step forward.
    w_packed, vecs = jax.block_until_ready(prepare_params(params))

    fwd = jax.jit(ae_forward)
    xhat_p, z_p = fwd(x, w_packed, vecs)
    jax.block_until_ready((xhat_p, z_p))

    assert xhat_p.shape == (batch, DIM)
    assert z_p.shape == (batch, DIM)

    # Test-only un-padding (production consumers should read the documented
    # lane-padded layout directly instead of paying these slice copies).
    x_hat = xhat_p[:, :in_dim]
    z = z_p[:, :z_dim]

    # Tight check vs a pure-JAX reference with the SAME numerics
    # (bf16 MXU operands, f32 accumulation / BN / sigmoid).
    x_hat_bf, z_bf = _ae_reference(x, params, matmul_dtype=jnp.bfloat16)
    assert jnp.allclose(x_hat, x_hat_bf, atol=2e-3, rtol=2e-3)
    assert jnp.allclose(z, z_bf, atol=2e-3, rtol=2e-3)

    # Looser sanity check vs the full-f32 PyTorch-semantics reference
    # (bounds the bf16 MXU-input error).
    x_hat_f32, z_f32 = _ae_reference(x, params, matmul_dtype=jnp.float32)
    assert jnp.allclose(x_hat, x_hat_f32, atol=2e-2, rtol=2e-2)
    assert jnp.allclose(z, z_f32, atol=2e-2, rtol=2e-2)

    print("KERNEL_OK")
</pallas_src>

<mosaic_0001>
module attributes {stable_mosaic.version = 11 : i64} {
  func.func @ae_kernel(%arg0: memref<8x128xf32, #tpu.memory_space<vmem>>, %arg1: memref<8x128x128xbf16, #tpu.memory_space<vmem>>, %arg2: memref<24x128xf32, #tpu.memory_space<vmem>>, %arg3: memref<8x128xf32, #tpu.memory_space<vmem>>, %arg4: memref<8x128xf32, #tpu.memory_space<vmem>>) attributes {dimension_semantics = [], scalar_prefetch = 0 : i64, scratch_operands = 0 : i64, tpu.core_type = #tpu.core_type<tc>} {
    %c0 = arith.constant 0 : index
    %c0_0 = arith.constant 0 : index
    %0 = vector.load %arg0[%c0, %c0_0] : memref<8x128xf32, #tpu.memory_space<vmem>>, vector<8x128xf32>
    %c0_1 = arith.constant 0 : index
    %c0_2 = arith.constant 0 : index
    %1 = vector.load %arg2[%c0_1, %c0_2] : memref<24x128xf32, #tpu.memory_space<vmem>>, vector<24x128xf32>
    %2 = arith.truncf %0 : vector<8x128xf32> to vector<8x128xbf16>
    %c0_3 = arith.constant 0 : index
    %c0_4 = arith.constant 0 : index
    %c0_5 = arith.constant 0 : index
    %3 = vector.load %arg1[%c0_3, %c0_4, %c0_5] : memref<8x128x128xbf16, #tpu.memory_space<vmem>>, vector<1x128x128xbf16>
    %4 = vector.shape_cast %3 : vector<1x128x128xbf16> to vector<128x128xbf16>
    %cst = arith.constant dense<0.000000e+00> : vector<8x128xf32>
    %5 = tpu.matmul %2, %4, %cst {dimension_numbers = #tpu.dot_dimension_numbers<[1], [0], [0], [1], [0, 0, 1, 1], [], []>} : vector<8x128xbf16>, vector<128x128xbf16>, vector<8x128xf32> -> vector<8x128xf32>
    %6 = vector.extract_strided_slice %1 {offsets = [0, 0], sizes = [1, 128], strides = [1, 1]} : vector<24x128xf32> to vector<1x128xf32>
    %7 = vector.broadcast %6 : vector<1x128xf32> to vector<8x128xf32>
    %8 = arith.addf %5, %7 : vector<8x128xf32>
    %cst_6 = arith.constant dense<0.000000e+00> : vector<128xf32>
    %9 = vector.multi_reduction <add>, %8, %cst_6 [0] : vector<8x128xf32> to vector<128xf32>
    %10 = vector.shape_cast %9 : vector<128xf32> to vector<1x128xf32>
    %cst_7 = arith.constant 8.000000e+00 : f32
    %11 = vector.broadcast %cst_7 : f32 to vector<1x128xf32>
    %12 = arith.divf %10, %11 : vector<1x128xf32>
    %13 = vector.broadcast %12 : vector<1x128xf32> to vector<8x128xf32>
    %14 = arith.subf %8, %13 : vector<8x128xf32>
    %15 = arith.mulf %14, %14 : vector<8x128xf32>
    %cst_8 = arith.constant dense<0.000000e+00> : vector<128xf32>
    %16 = vector.multi_reduction <add>, %15, %cst_8 [0] : vector<8x128xf32> to vector<128xf32>
    %17 = vector.shape_cast %16 : vector<128xf32> to vector<1x128xf32>
    %cst_9 = arith.constant 8.000000e+00 : f32
    %18 = vector.broadcast %cst_9 : f32 to vector<1x128xf32>
    %19 = arith.divf %17, %18 : vector<1x128xf32>
    %20 = vector.extract_strided_slice %1 {offsets = [1, 0], sizes = [1, 128], strides = [1, 1]} : vector<24x128xf32> to vector<1x128xf32>
    %cst_10 = arith.constant 9.99999974E-6 : f32
    %21 = vector.broadcast %cst_10 : f32 to vector<1x128xf32>
    %22 = arith.addf %19, %21 : vector<1x128xf32>
    %23 = math.rsqrt %22 : vector<1x128xf32>
    %24 = arith.mulf %20, %23 : vector<1x128xf32>
    %25 = vector.broadcast %24 : vector<1x128xf32> to vector<8x128xf32>
    %26 = arith.mulf %14, %25 : vector<8x128xf32>
    %27 = vector.extract_strided_slice %1 {offsets = [2, 0], sizes = [1, 128], strides = [1, 1]} : vector<24x128xf32> to vector<1x128xf32>
    %28 = vector.broadcast %27 : vector<1x128xf32> to vector<8x128xf32>
    %29 = arith.addf %26, %28 : vector<8x128xf32>
    %cst_11 = arith.constant 0.00999999977 : f32
    %30 = vector.broadcast %cst_11 : f32 to vector<8x128xf32>
    %31 = arith.mulf %30, %29 : vector<8x128xf32>
    %32 = arith.maximumf %29, %31 : vector<8x128xf32>
    %33 = arith.truncf %32 : vector<8x128xf32> to vector<8x128xbf16>
    %c1 = arith.constant 1 : index
    %c0_12 = arith.constant 0 : index
    %c0_13 = arith.constant 0 : index
    %34 = vector.load %arg1[%c1, %c0_12, %c0_13] : memref<8x128x128xbf16, #tpu.memory_space<vmem>>, vector<1x128x128xbf16>
    %35 = vector.shape_cast %34 : vector<1x128x128xbf16> to vector<128x128xbf16>
    %cst_14 = arith.constant dense<0.000000e+00> : vector<8x128xf32>
    %36 = tpu.matmul %33, %35, %cst_14 {dimension_numbers = #tpu.dot_dimension_numbers<[1], [0], [0], [1], [0, 0, 1, 1], [], []>} : vector<8x128xbf16>, vector<128x128xbf16>, vector<8x128xf32> -> vector<8x128xf32>
    %37 = vector.extract_strided_slice %1 {offsets = [3, 0], sizes = [1, 128], strides = [1, 1]} : vector<24x128xf32> to vector<1x128xf32>
    %38 = vector.broadcast %37 : vector<1x128xf32> to vector<8x128xf32>
    %39 = arith.addf %36, %38 : vector<8x128xf32>
    %cst_15 = arith.constant dense<0.000000e+00> : vector<128xf32>
    %40 = vector.multi_reduction <add>, %39, %cst_15 [0] : vector<8x128xf32> to vector<128xf32>
    %41 = vector.shape_cast %40 : vector<128xf32> to vector<1x128xf32>
    %cst_16 = arith.constant 8.000000e+00 : f32
    %42 = vector.broadcast %cst_16 : f32 to vector<1x128xf32>
    %43 = arith.divf %41, %42 : vector<1x128xf32>
    %44 = vector.broadcast %43 : vector<1x128xf32> to vector<8x128xf32>
    %45 = arith.subf %39, %44 : vector<8x128xf32>
    %46 = arith.mulf %45, %45 : vector<8x128xf32>
    %cst_17 = arith.constant dense<0.000000e+00> : vector<128xf32>
    %47 = vector.multi_reduction <add>, %46, %cst_17 [0] : vector<8x128xf32> to vector<128xf32>
    %48 = vector.shape_cast %47 : vector<128xf32> to vector<1x128xf32>
    %cst_18 = arith.constant 8.000000e+00 : f32
    %49 = vector.broadcast %cst_18 : f32 to vector<1x128xf32>
    %50 = arith.divf %48, %49 : vector<1x128xf32>
    %51 = vector.extract_strided_slice %1 {offsets = [4, 0], sizes = [1, 128], strides = [1, 1]} : vector<24x128xf32> to vector<1x128xf32>
    %cst_19 = arith.constant 9.99999974E-6 : f32
    %52 = vector.broadcast %cst_19 : f32 to vector<1x128xf32>
    %53 = arith.addf %50, %52 : vector<1x128xf32>
    %54 = math.rsqrt %53 : vector<1x128xf32>
    %55 = arith.mulf %51, %54 : vector<1x128xf32>
    %56 = vector.broadcast %55 : vector<1x128xf32> to vector<8x128xf32>
    %57 = arith.mulf %45, %56 : vector<8x128xf32>
    %58 = vector.extract_strided_slice %1 {offsets = [5, 0], sizes = [1, 128], strides = [1, 1]} : vector<24x128xf32> to vector<1x128xf32>
    %59 = vector.broadcast %58 : vector<1x128xf32> to vector<8x128xf32>
    %60 = arith.addf %57, %59 : vector<8x128xf32>
    %cst_20 = arith.constant 0.00999999977 : f32
    %61 = vector.broadcast %cst_20 : f32 to vector<8x128xf32>
    %62 = arith.mulf %61, %60 : vector<8x128xf32>
    %63 = arith.maximumf %60, %62 : vector<8x128xf32>
    %64 = arith.truncf %63 : vector<8x128xf32> to vector<8x128xbf16>
    %c2 = arith.constant 2 : index
    %c0_21 = arith.constant 0 : index
    %c0_22 = arith.constant 0 : index
    %65 = vector.load %arg1[%c2, %c0_21, %c0_22] : memref<8x128x128xbf16, #tpu.memory_space<vmem>>, vector<1x128x128xbf16>
    %66 = vector.shape_cast %65 : vector<1x128x128xbf16> to vector<128x128xbf16>
    %cst_23 = arith.constant dense<0.000000e+00> : vector<8x128xf32>
    %67 = tpu.matmul %64, %66, %cst_23 {dimension_numbers = #tpu.dot_dimension_numbers<[1], [0], [0], [1], [0, 0, 1, 1], [], []>} : vector<8x128xbf16>, vector<128x128xbf16>, vector<8x128xf32> -> vector<8x128xf32>
    %68 = vector.extract_strided_slice %1 {offsets = [6, 0], sizes = [1, 128], strides = [1, 1]} : vector<24x128xf32> to vector<1x128xf32>
    %69 = vector.broadcast %68 : vector<1x128xf32> to vector<8x128xf32>
    %70 = arith.addf %67, %69 : vector<8x128xf32>
    %cst_24 = arith.constant dense<0.000000e+00> : vector<128xf32>
    %71 = vector.multi_reduction <add>, %70, %cst_24 [0] : vector<8x128xf32> to vector<128xf32>
    %72 = vector.shape_cast %71 : vector<128xf32> to vector<1x128xf32>
    %cst_25 = arith.constant 8.000000e+00 : f32
    %73 = vector.broadcast %cst_25 : f32 to vector<1x128xf32>
    %74 = arith.divf %72, %73 : vector<1x128xf32>
    %75 = vector.broadcast %74 : vector<1x128xf32> to vector<8x128xf32>
    %76 = arith.subf %70, %75 : vector<8x128xf32>
    %77 = arith.mulf %76, %76 : vector<8x128xf32>
    %cst_26 = arith.constant dense<0.000000e+00> : vector<128xf32>
    %78 = vector.multi_reduction <add>, %77, %cst_26 [0] : vector<8x128xf32> to vector<128xf32>
    %79 = vector.shape_cast %78 : vector<128xf32> to vector<1x128xf32>
    %cst_27 = arith.constant 8.000000e+00 : f32
    %80 = vector.broadcast %cst_27 : f32 to vector<1x128xf32>
    %81 = arith.divf %79, %80 : vector<1x128xf32>
    %82 = vector.extract_strided_slice %1 {offsets = [7, 0], sizes = [1, 128], strides = [1, 1]} : vector<24x128xf32> to vector<1x128xf32>
    %cst_28 = arith.constant 9.99999974E-6 : f32
    %83 = vector.broadcast %cst_28 : f32 to vector<1x128xf32>
    %84 = arith.addf %81, %83 : vector<1x128xf32>
    %85 = math.rsqrt %84 : vector<1x128xf32>
    %86 = arith.mulf %82, %85 : vector<1x128xf32>
    %87 = vector.broadcast %86 : vector<1x128xf32> to vector<8x128xf32>
    %88 = arith.mulf %76, %87 : vector<8x128xf32>
    %89 = vector.extract_strided_slice %1 {offsets = [8, 0], sizes = [1, 128], strides = [1, 1]} : vector<24x128xf32> to vector<1x128xf32>
    %90 = vector.broadcast %89 : vector<1x128xf32> to vector<8x128xf32>
    %91 = arith.addf %88, %90 : vector<8x128xf32>
    %cst_29 = arith.constant 0.00999999977 : f32
    %92 = vector.broadcast %cst_29 : f32 to vector<8x128xf32>
    %93 = arith.mulf %92, %91 : vector<8x128xf32>
    %94 = arith.maximumf %91, %93 : vector<8x128xf32>
    %95 = arith.truncf %94 : vector<8x128xf32> to vector<8x128xbf16>
    %c3 = arith.constant 3 : index
    %c0_30 = arith.constant 0 : index
    %c0_31 = arith.constant 0 : index
    %96 = vector.load %arg1[%c3, %c0_30, %c0_31] : memref<8x128x128xbf16, #tpu.memory_space<vmem>>, vector<1x128x128xbf16>
    %97 = vector.shape_cast %96 : vector<1x128x128xbf16> to vector<128x128xbf16>
    %cst_32 = arith.constant dense<0.000000e+00> : vector<8x128xf32>
    %98 = tpu.matmul %95, %97, %cst_32 {dimension_numbers = #tpu.dot_dimension_numbers<[1], [0], [0], [1], [0, 0, 1, 1], [], []>} : vector<8x128xbf16>, vector<128x128xbf16>, vector<8x128xf32> -> vector<8x128xf32>
    %99 = vector.extract_strided_slice %1 {offsets = [9, 0], sizes = [1, 128], strides = [1, 1]} : vector<24x128xf32> to vector<1x128xf32>
    %100 = vector.broadcast %99 : vector<1x128xf32> to vector<8x128xf32>
    %101 = arith.addf %98, %100 : vector<8x128xf32>
    %c0_33 = arith.constant 0 : index
    %c0_34 = arith.constant 0 : index
    %102 = vector.load %arg4[%c0_33, %c0_34] : memref<8x128xf32, #tpu.memory_space<vmem>>, vector<8x128xf32>
    tpu.vector_store %arg4[%c0_33, %c0_34], %101 {strides = array<i32>} : memref<8x128xf32, #tpu.memory_space<vmem>>, vector<8x128xf32>,
    %103 = arith.truncf %101 : vector<8x128xf32> to vector<8x128xbf16>
    %c4 = arith.constant 4 : index
    %c0_35 = arith.constant 0 : index
    %c0_36 = arith.constant 0 : index
    %104 = vector.load %arg1[%c4, %c0_35, %c0_36] : memref<8x128x128xbf16, #tpu.memory_space<vmem>>, vector<1x128x128xbf16>
    %105 = vector.shape_cast %104 : vector<1x128x128xbf16> to vector<128x128xbf16>
    %cst_37 = arith.constant dense<0.000000e+00> : vector<8x128xf32>
    %106 = tpu.matmul %103, %105, %cst_37 {dimension_numbers = #tpu.dot_dimension_numbers<[1], [0], [0], [1], [0, 0, 1, 1], [], []>} : vector<8x128xbf16>, vector<128x128xbf16>, vector<8x128xf32> -> vector<8x128xf32>
    %107 = vector.extract_strided_slice %1 {offsets = [10, 0], sizes = [1, 128], strides = [1, 1]} : vector<24x128xf32> to vector<1x128xf32>
    %108 = vector.broadcast %107 : vector<1x128xf32> to vector<8x128xf32>
    %109 = arith.addf %106, %108 : vector<8x128xf32>
    %cst_38 = arith.constant dense<0.000000e+00> : vector<128xf32>
    %110 = vector.multi_reduction <add>, %109, %cst_38 [0] : vector<8x128xf32> to vector<128xf32>
    %111 = vector.shape_cast %110 : vector<128xf32> to vector<1x128xf32>
    %cst_39 = arith.constant 8.000000e+00 : f32
    %112 = vector.broadcast %cst_39 : f32 to vector<1x128xf32>
    %113 = arith.divf %111, %112 : vector<1x128xf32>
    %114 = vector.broadcast %113 : vector<1x128xf32> to vector<8x128xf32>
    %115 = arith.subf %109, %114 : vector<8x128xf32>
    %116 = arith.mulf %115, %115 : vector<8x128xf32>
    %cst_40 = arith.constant dense<0.000000e+00> : vector<128xf32>
    %117 = vector.multi_reduction <add>, %116, %cst_40 [0] : vector<8x128xf32> to vector<128xf32>
    %118 = vector.shape_cast %117 : vector<128xf32> to vector<1x128xf32>
    %cst_41 = arith.constant 8.000000e+00 : f32
    %119 = vector.broadcast %cst_41 : f32 to vector<1x128xf32>
    %120 = arith.divf %118, %119 : vector<1x128xf32>
    %121 = vector.extract_strided_slice %1 {offsets = [11, 0], sizes = [1, 128], strides = [1, 1]} : vector<24x128xf32> to vector<1x128xf32>
    %cst_42 = arith.constant 9.99999974E-6 : f32
    %122 = vector.broadcast %cst_42 : f32 to vector<1x128xf32>
    %123 = arith.addf %120, %122 : vector<1x128xf32>
    %124 = math.rsqrt %123 : vector<1x128xf32>
    %125 = arith.mulf %121, %124 : vector<1x128xf32>
    %126 = vector.broadcast %125 : vector<1x128xf32> to vector<8x128xf32>
    %127 = arith.mulf %115, %126 : vector<8x128xf32>
    %128 = vector.extract_strided_slice %1 {offsets = [12, 0], sizes = [1, 128], strides = [1, 1]} : vector<24x128xf32> to vector<1x128xf32>
    %129 = vector.broadcast %128 : vector<1x128xf32> to vector<8x128xf32>
    %130 = arith.addf %127, %129 : vector<8x128xf32>
    %cst_43 = arith.constant 0.00999999977 : f32
    %131 = vector.broadcast %cst_43 : f32 to vector<8x128xf32>
    %132 = arith.mulf %131, %130 : vector<8x128xf32>
    %133 = arith.maximumf %130, %132 : vector<8x128xf32>
    %134 = arith.truncf %133 : vector<8x128xf32> to vector<8x128xbf16>
    %c5 = arith.constant 5 : index
    %c0_44 = arith.constant 0 : index
    %c0_45 = arith.constant 0 : index
    %135 = vector.load %arg1[%c5, %c0_44, %c0_45] : memref<8x128x128xbf16, #tpu.memory_space<vmem>>, vector<1x128x128xbf16>
    %136 = vector.shape_cast %135 : vector<1x128x128xbf16> to vector<128x128xbf16>
    %cst_46 = arith.constant dense<0.000000e+00> : vector<8x128xf32>
    %137 = tpu.matmul %134, %136, %cst_46 {dimension_numbers = #tpu.dot_dimension_numbers<[1], [0], [0], [1], [0, 0, 1, 1], [], []>} : vector<8x128xbf16>, vector<128x128xbf16>, vector<8x128xf32> -> vector<8x128xf32>
    %138 = vector.extract_strided_slice %1 {offsets = [13, 0], sizes = [1, 128], strides = [1, 1]} : vector<24x128xf32> to vector<1x128xf32>
    %139 = vector.broadcast %138 : vector<1x128xf32> to vector<8x128xf32>
    %140 = arith.addf %137, %139 : vector<8x128xf32>
    %cst_47 = arith.constant dense<0.000000e+00> : vector<128xf32>
    %141 = vector.multi_reduction <add>, %140, %cst_47 [0] : vector<8x128xf32> to vector<128xf32>
    %142 = vector.shape_cast %141 : vector<128xf32> to vector<1x128xf32>
    %cst_48 = arith.constant 8.000000e+00 : f32
    %143 = vector.broadcast %cst_48 : f32 to vector<1x128xf32>
    %144 = arith.divf %142, %143 : vector<1x128xf32>
    %145 = vector.broadcast %144 : vector<1x128xf32> to vector<8x128xf32>
    %146 = arith.subf %140, %145 : vector<8x128xf32>
    %147 = arith.mulf %146, %146 : vector<8x128xf32>
    %cst_49 = arith.constant dense<0.000000e+00> : vector<128xf32>
    %148 = vector.multi_reduction <add>, %147, %cst_49 [0] : vector<8x128xf32> to vector<128xf32>
    %149 = vector.shape_cast %148 : vector<128xf32> to vector<1x128xf32>
    %cst_50 = arith.constant 8.000000e+00 : f32
    %150 = vector.broadcast %cst_50 : f32 to vector<1x128xf32>
    %151 = arith.divf %149, %150 : vector<1x128xf32>
    %152 = vector.extract_strided_slice %1 {offsets = [14, 0], sizes = [1, 128], strides = [1, 1]} : vector<24x128xf32> to vector<1x128xf32>
    %cst_51 = arith.constant 9.99999974E-6 : f32
    %153 = vector.broadcast %cst_51 : f32 to vector<1x128xf32>
    %154 = arith.addf %151, %153 : vector<1x128xf32>
    %155 = math.rsqrt %154 : vector<1x128xf32>
    %156 = arith.mulf %152, %155 : vector<1x128xf32>
    %157 = vector.broadcast %156 : vector<1x128xf32> to vector<8x128xf32>
    %158 = arith.mulf %146, %157 : vector<8x128xf32>
    %159 = vector.extract_strided_slice %1 {offsets = [15, 0], sizes = [1, 128], strides = [1, 1]} : vector<24x128xf32> to vector<1x128xf32>
    %160 = vector.broadcast %159 : vector<1x128xf32> to vector<8x128xf32>
    %161 = arith.addf %158, %160 : vector<8x128xf32>
    %cst_52 = arith.constant 0.00999999977 : f32
    %162 = vector.broadcast %cst_52 : f32 to vector<8x128xf32>
    %163 = arith.mulf %162, %161 : vector<8x128xf32>
    %164 = arith.maximumf %161, %163 : vector<8x128xf32>
    %165 = arith.truncf %164 : vector<8x128xf32> to vector<8x128xbf16>
    %c6 = arith.constant 6 : index
    %c0_53 = arith.constant 0 : index
    %c0_54 = arith.constant 0 : index
    %166 = vector.load %arg1[%c6, %c0_53, %c0_54] : memref<8x128x128xbf16, #tpu.memory_space<vmem>>, vector<1x128x128xbf16>
    %167 = vector.shape_cast %166 : vector<1x128x128xbf16> to vector<128x128xbf16>
    %cst_55 = arith.constant dense<0.000000e+00> : vector<8x128xf32>
    %168 = tpu.matmul %165, %167, %cst_55 {dimension_numbers = #tpu.dot_dimension_numbers<[1], [0], [0], [1], [0, 0, 1, 1], [], []>} : vector<8x128xbf16>, vector<128x128xbf16>, vector<8x128xf32> -> vector<8x128xf32>
    %169 = vector.extract_strided_slice %1 {offsets = [16, 0], sizes = [1, 128], strides = [1, 1]} : vector<24x128xf32> to vector<1x128xf32>
    %170 = vector.broadcast %169 : vector<1x128xf32> to vector<8x128xf32>
    %171 = arith.addf %168, %170 : vector<8x128xf32>
    %cst_56 = arith.constant dense<0.000000e+00> : vector<128xf32>
    %172 = vector.multi_reduction <add>, %171, %cst_56 [0] : vector<8x128xf32> to vector<128xf32>
    %173 = vector.shape_cast %172 : vector<128xf32> to vector<1x128xf32>
    %cst_57 = arith.constant 8.000000e+00 : f32
    %174 = vector.broadcast %cst_57 : f32 to vector<1x128xf32>
    %175 = arith.divf %173, %174 : vector<1x128xf32>
    %176 = vector.broadcast %175 : vector<1x128xf32> to vector<8x128xf32>
    %177 = arith.subf %171, %176 : vector<8x128xf32>
    %178 = arith.mulf %177, %177 : vector<8x128xf32>
    %cst_58 = arith.constant dense<0.000000e+00> : vector<128xf32>
    %179 = vector.multi_reduction <add>, %178, %cst_58 [0] : vector<8x128xf32> to vector<128xf32>
    %180 = vector.shape_cast %179 : vector<128xf32> to vector<1x128xf32>
    %cst_59 = arith.constant 8.000000e+00 : f32
    %181 = vector.broadcast %cst_59 : f32 to vector<1x128xf32>
    %182 = arith.divf %180, %181 : vector<1x128xf32>
    %183 = vector.extract_strided_slice %1 {offsets = [17, 0], sizes = [1, 128], strides = [1, 1]} : vector<24x128xf32> to vector<1x128xf32>
    %cst_60 = arith.constant 9.99999974E-6 : f32
    %184 = vector.broadcast %cst_60 : f32 to vector<1x128xf32>
    %185 = arith.addf %182, %184 : vector<1x128xf32>
    %186 = math.rsqrt %185 : vector<1x128xf32>
    %187 = arith.mulf %183, %186 : vector<1x128xf32>
    %188 = vector.broadcast %187 : vector<1x128xf32> to vector<8x128xf32>
    %189 = arith.mulf %177, %188 : vector<8x128xf32>
    %190 = vector.extract_strided_slice %1 {offsets = [18, 0], sizes = [1, 128], strides = [1, 1]} : vector<24x128xf32> to vector<1x128xf32>
    %191 = vector.broadcast %190 : vector<1x128xf32> to vector<8x128xf32>
    %192 = arith.addf %189, %191 : vector<8x128xf32>
    %cst_61 = arith.constant 0.00999999977 : f32
    %193 = vector.broadcast %cst_61 : f32 to vector<8x128xf32>
    %194 = arith.mulf %193, %192 : vector<8x128xf32>
    %195 = arith.maximumf %192, %194 : vector<8x128xf32>
    %196 = arith.truncf %195 : vector<8x128xf32> to vector<8x128xbf16>
    %c7 = arith.constant 7 : index
    %c0_62 = arith.constant 0 : index
    %c0_63 = arith.constant 0 : index
    %197 = vector.load %arg1[%c7, %c0_62, %c0_63] : memref<8x128x128xbf16, #tpu.memory_space<vmem>>, vector<1x128x128xbf16>
    %198 = vector.shape_cast %197 : vector<1x128x128xbf16> to vector<128x128xbf16>
    %cst_64 = arith.constant dense<0.000000e+00> : vector<8x128xf32>
    %199 = tpu.matmul %196, %198, %cst_64 {dimension_numbers = #tpu.dot_dimension_numbers<[1], [0], [0], [1], [0, 0, 1, 1], [], []>} : vector<8x128xbf16>, vector<128x128xbf16>, vector<8x128xf32> -> vector<8x128xf32>
    %200 = vector.extract_strided_slice %1 {offsets = [19, 0], sizes = [1, 128], strides = [1, 1]} : vector<24x128xf32> to vector<1x128xf32>
    %201 = vector.broadcast %200 : vector<1x128xf32> to vector<8x128xf32>
    %202 = arith.addf %199, %201 : vector<8x128xf32>
    %203 = arith.negf %202 : vector<8x128xf32>
    %204 = math.exp %203 : vector<8x128xf32>
    %cst_65 = arith.constant 1.000000e+00 : f32
    %205 = vector.broadcast %cst_65 : f32 to vector<8x128xf32>
    %206 = arith.addf %205, %204 : vector<8x128xf32>
    %207 = arith.divf %205, %206 : vector<8x128xf32>
    %c0_66 = arith.constant 0 : index
    %c0_67 = arith.constant 0 : index
    %208 = vector.load %arg3[%c0_66, %c0_67] : memref<8x128xf32, #tpu.memory_space<vmem>>, vector<8x128xf32>
    tpu.vector_store %arg3[%c0_66, %c0_67], %207 {strides = array<i32>} : memref<8x128xf32, #tpu.memory_space<vmem>>, vector<8x128xf32>,
    return
  }
}

</mosaic_0001>

<bundles_post_ra>
// kernel: ae_forward.1
= control target key start
LH: loop header
LB: loop body
LE: loop exit
PB: predicated region body
PF: predicated region fallthrough
CT: control target
= control target key end

     0   :  { %10 = vsyncpa [#allocation3], 0  ;;  %s1822_s0 = inlined_call_operand.vmem [shape: f32[8,128], index: 0, kind: input, shape index: {}]   ;;  %s1823_s1 = inlined_call_operand.hbm [shape: bf16[8,128,128], index: 1, kind: input, shape index: {}]   ;;  %s1824_s2 = inlined_call_operand.vmem [shape: f32[24,128], index: 2, kind: input, shape index: {}]   ;;  %s1825_s3 = inlined_call_operand.hbm [shape: f32[8,128], index: 3, kind: output, shape index: {0}]   ;;  %s1826_s4 = inlined_call_operand.hbm [shape: f32[8,128], index: 4, kind: output, shape index: {1}]  }
   0x1   :  { %11 = vsyncpa [#allocation4], 0 }
   0x2   :  { %12 = vsyncpa [#allocation7], 0  ;;  %s1596_s15 = smov [#allocation2]   ;;  %s1524_s19 = scalar_lea.hbm %s1823_s1, 8192 }
   0x3   :  { %s20_s16 = sshll.u32 %s1596_s15, 4  ;;  %p1525_p0 = scmp.ne.s32.totalorder %s1823_s1, %s1524_s19  ;;  %s21_s16 = int_to_ptr.vmem [resolvable:$true] %s20_s16 }
   0x4   :  { %p1528_p1 = scmp.lt.u32.totalorder %s1524_s19, %s1823_s1 }
   0x6   :  { %p1530_p2 = pnand %p1528_p1, %p1525_p0 }
   0x8   :  { %1533 = shalt.err (!%p1530_p2)
}
   0x9   :  { %s1534_s24 = scalar_lea.vmem %s21_s16, 8192  ;;  %p1539_p4 = scmp.lt.s32.totalorder %s21_s16, %s21_s16 }
   0xa   :  { %p1535_p3 = scmp.ne.s32.totalorder %s21_s16, %s1534_s24  ;;  %p1540_p5 = scmp.lt.s32.totalorder %s1534_s24, %s1534_s24 }
   0xc   :  { %p1541_p6 = por %p1540_p5, %p1539_p4 }
   0xe   :  { %p1542_p7 = pnand %p1541_p6, %p1535_p3 }
  0x10   :  { %1545 = shalt.err (!%p1542_p7)
}
  0x11   :  { %s1597_s25 = smov 64   ;;  %s1598_s26 = smov 4  }
  0x12   :  { %26 = dma.hbm_to_vmem [thread:$0]  %s1823_s1, 8192, %s21_s16, [#allocation3], %s1597_s25, %s1597_s25, %s1598_s26  }
  0x13   :  { %1590 = dma.done.wait [#allocation3], 8192  }
  0x14   :  { %1591 = vsyncadd [#allocation3], 4294959104  ;;  %v1599_v0 = vmov 0.0   ;;  %vm1600_vm0 = vmmov 0   ;;  %v1444_v1 = vld [vmem:[#allocation2] sm:$0xff]   ;;  %v1445_v2 = vld [vmem:[#allocation2 + $0x8] sm:$0xff]   ;;  %v54_v19 = vlaneseq }
  0x15   :  { %1277 = vmatprep.subr.bf16.mxu0 %v1599_v0  ;;  %1293 = vmatprep.mubr.msk.bf16.mxu0 %vm1600_vm0, %v1599_v0  ;;  %v1446_v3 = vld [vmem:[#allocation2 + $0x10] sm:$0xff]   ;;  %v1447_v4 = vld [vmem:[#allocation2 + $0x18] sm:$0xff]   ;;  %v1448_v5 = vld [vmem:[#allocation2 + $0x20] sm:$0xff]  }
  0x16   :  { %1297 = vmatprep.subr.bf16.mxu1 %v1599_v0  ;;  %1313 = vmatprep.mubr.msk.bf16.mxu1 %vm1600_vm0, %v1599_v0  ;;  %v1449_v6 = vld [vmem:[#allocation2 + $0x28] sm:$0xff]   ;;  %v1450_v7 = vld [vmem:[#allocation2 + $0x30] sm:$0xff]   ;;  %v1451_v8 = vld [vmem:[#allocation2 + $0x38] sm:$0xff]   ;;  %v1667_v20 = vshrl.u32 %v54_v19, 7 }
  0x17   :  { %1278 = vmatpush3.bf16.msra.mxu0 %v1444_v1  ;;  %v33_v9 = vld [vmem:[%s1822_s0] sm:$0xff]  ;;  %v1453_v12 = vld [vmem:[#allocation2 + $0x48] sm:$0xff]   ;;  %v1454_v13 = vld [vmem:[#allocation2 + $0x50] sm:$0xff]  }
  0x18   :  { %1279 = vmatprep.subr.bf16.mxu0 %v1599_v0  ;;  %v37_v10 = vpack.c.bf16 %v33_v9, %v33_v9  ;;  %v1452_v11 = vld [vmem:[#allocation2 + $0x40] sm:$0xff]   ;;  %v1455_v14 = vld [vmem:[#allocation2 + $0x58] sm:$0xff]   ;;  %v1457_v16 = vld [vmem:[#allocation2 + $0x68] sm:$0xff]   ;;  %v1670_v21 = vsub.s32 0, %v1667_v20  ;;  %v1680_v46 = vsub.s32 1, %v1667_v20  ;;  %v1683_v47 = vsub.s32 2, %v1667_v20 }
  0x19   :  { %1298 = vmatpush3.bf16.msra.mxu1 %v1452_v11  ;;  %v1456_v15 = vld [vmem:[#allocation2 + $0x60] sm:$0xff]   ;;  %v1458_v17 = vld [vmem:[#allocation2 + $0x70] sm:$0xff]   ;;  %v1459_v18 = vld [vmem:[#allocation2 + $0x78] sm:$0xff]  }
  0x1a   :  { %1299 = vmatprep.subr.bf16.mxu1 %v1599_v0  ;;  %v1675_v22 = vld [vmem:[%s1824_s2] sm:$0xff]  ;;  %v1461_v58 = vld [vmem:[#allocation2 + $0x88] sm:$0xff]   ;;  %v1462_v59 = vld [vmem:[#allocation2 + $0x90] sm:$0xff]  }
  0x1b   :  { %1280 = vmatpush3.bf16.msra.mxu0 %v1445_v2  ;;  %v57_v23 = vrot.slane %v1675_v22, %v1670_v21  ;;  %v174_v51 = vrot.slane %v1675_v22, %v1683_v47  ;;  %v1460_v57 = vld [vmem:[#allocation2 + $0x80] sm:$0xff]   ;;  %v1463_v60 = vld [vmem:[#allocation2 + $0x98] sm:$0xff]   ;;  %v1465_v62 = vld [vmem:[#allocation2 + $0xa8] sm:$0xff]   ;;  %v1700_v2 = vsub.s32 3, %v1667_v20 }
  0x1c   :  { %1281 = vmatprep.subr.bf16.mxu0 %v1599_v0  ;;  %v1464_v61 = vld [vmem:[#allocation2 + $0xa0] sm:$0xff]   ;;  %v1466_v63 = vld [vmem:[#allocation2 + $0xb0] sm:$0xff]   ;;  %v1467_v1 = vld [vmem:[#allocation2 + $0xb8] sm:$0xff]  }
  0x1d   :  { %1300 = vmatpush3.bf16.msra.mxu1 %v1453_v12 }
  0x1e   :  { %1301 = vmatprep.subr.bf16.mxu1 %v1599_v0 }
  0x1f   :  { %1282 = vmatpush3.bf16.msra.mxu0 %v1446_v3  ;;  %v199_v3 = vrot.slane %v1675_v22, %v1700_v2 }
  0x20   :  { %1283 = vmatprep.subr.bf16.mxu0 %v1599_v0 }
  0x21   :  { %1302 = vmatpush3.bf16.msra.mxu1 %v1454_v13 }
  0x22   :  { %1303 = vmatprep.subr.bf16.mxu1 %v1599_v0 }
  0x23   :  { %1284 = vmatpush3.bf16.msra.mxu0 %v1447_v4 }
  0x24   :  { %1285 = vmatprep.subr.bf16.mxu0 %v1599_v0 }
  0x25   :  { %1304 = vmatpush3.bf16.msra.mxu1 %v1455_v14 }
  0x26   :  { %1305 = vmatprep.subr.bf16.mxu1 %v1599_v0 }
  0x27   :  { %1286 = vmatpush3.bf16.msra.mxu0 %v1448_v5 }
  0x28   :  { %1287 = vmatprep.subr.bf16.mxu0 %v1599_v0 }
  0x29   :  { %1306 = vmatpush3.bf16.msra.mxu1 %v1456_v15 }
  0x2a   :  { %1307 = vmatprep.subr.bf16.mxu1 %v1599_v0 }
  0x2b   :  { %1288 = vmatpush3.bf16.msra.mxu0 %v1449_v6 }
  0x2c   :  { %1289 = vmatprep.subr.bf16.mxu0 %v1599_v0 }
  0x2d   :  { %1308 = vmatpush3.bf16.msra.mxu1 %v1457_v16 }
  0x2e   :  { %1309 = vmatprep.subr.bf16.mxu1 %v1599_v0 }
  0x2f   :  { %1290 = vmatpush3.bf16.msra.mxu0 %v1450_v7 }
  0x30   :  { %1291 = vmatprep.subr.bf16.mxu0 %v1599_v0 }
  0x31   :  { %1310 = vmatpush3.bf16.msra.mxu1 %v1458_v17 }
  0x32   :  { %1311 = vmatprep.subr.bf16.mxu1 %v1599_v0 }
  0x33   :  { %1292 = vmatpush3.bf16.msra.mxu0 %v1451_v8 }
  0x34   :  { %1317 = vmatprep.subr.bf16.mxu0 %v1599_v0 }
  0x35   :  { %1312 = vmatpush3.bf16.msra.mxu1 %v1459_v18 }
  0x36   :  { %1294 = vmatmul.mubr.bf16.vlgmr.msra.gmra.mrb[0].mxu0 %v37_v10  ;;  %1337 = vmatprep.subr.bf16.mxu1 %v1599_v0 }
  0x37   :  { %1333 = vmatprep.mubr.msk.bf16.mxu0 %vm1600_vm0, %v1599_v0  ;;  %1318 = vmatpush3.bf16.msra.mxu0 %v1460_v57  ;;  %v339_v57 = vsub.s32 6, %v1667_v20 }
  0x38   :  { %1319 = vmatprep.subr.bf16.mxu0 %v1599_v0 }
  0x3b   :  { %1320 = vmatpush3.bf16.msra.mxu0 %v1461_v58  ;;  %v340_v58 = vrot.slane %v1675_v22, %v339_v57 }
  0x3c   :  { %1321 = vmatprep.subr.bf16.mxu0 %v1599_v0 }
  0x3f   :  { %1322 = vmatpush3.bf16.msra.mxu0 %v1462_v59 }
  0x40   :  { %1323 = vmatprep.subr.bf16.mxu0 %v1599_v0 }
  0x43   :  { %1324 = vmatpush3.bf16.msra.mxu0 %v1463_v60 }
  0x44   :  { %1325 = vmatprep.subr.bf16.mxu0 %v1599_v0 }
  0x47   :  { %1326 = vmatpush3.bf16.msra.mxu0 %v1464_v61 }
  0x48   :  { %1327 = vmatprep.subr.bf16.mxu0 %v1599_v0 }
  0x4b   :  { %1328 = vmatpush3.bf16.msra.mxu0 %v1465_v62 }
  0x4c   :  { %1329 = vmatprep.subr.bf16.mxu0 %v1599_v0 }
  0x4f   :  { %1330 = vmatpush3.bf16.msra.mxu0 %v1466_v63 }
  0x50   :  { %1331 = vmatprep.subr.bf16.mxu0 %v1599_v0 }
  0x53   :  { %1332 = vmatpush3.bf16.msra.mxu0 %v1467_v1 }
  0x54   :  { %1357 = vmatprep.subr.bf16.mxu0 %v1599_v0 }
 0x109   :  { %v140_v24 = vpop.f32.mrb[0].mxu0 }
 0x10a   :  { %v141_v25 = vadd.f32 %v140_v24, %v57_v23  ;;  %v1295_v26 = vpop.f32.mrb[1].mxu0 }
 0x10b   :  { %v143_v27 = vpop.f32.mrb[2].mxu0 }
 0x10c   :  { %v146_v28 = vrot.slane %v141_v25, 4  ;;  %v1296_v29 = vpop.f32.mrb[3].mxu0 }
 0x10d   :  { %v309_v29 = vsub.s32 4, %v1667_v20 }
 0x10e   :  { %v147_v30 = vadd.f32 %v146_v28, %v141_v25 }
 0x110   :  { %v148_v31 = vrot.slane %v147_v30, 2 }
 0x112   :  { %v149_v32 = vadd.f32 %v148_v31, %v147_v30  ;;  %v314_v30 = vsub.s32 5, %v1667_v20 }
 0x114   :  { %v150_v33 = vrot.slane %v149_v32, 1 }
 0x116   :  { %v151_v34 = vadd.f32 %v150_v33, %v149_v32 }
 0x118   :  { %v153_v35 = vmul.f32 0.125, %v151_v34  ;;  %v315_v34 = vrot.slane %v1675_v22, %v314_v30 }
 0x11a   :  { %v154_v36 = vsub.f32 %v141_v25, %v153_v35 }
 0x11c   :  { %v155_v37 = vmul.f32 %v154_v36, %v154_v36 }
 0x11e   :  { %v156_v38 = vrot.slane %v155_v37, 4 }
 0x120   :  { %v157_v39 = vadd.f32 %v156_v38, %v155_v37 }
 0x122   :  { %v158_v40 = vrot.slane %v157_v39, 2 }
 0x124   :  { %v159_v41 = vadd.f32 %v158_v40, %v157_v39  ;;  %v1468_v40 = vld [vmem:[#allocation2 + $0xc0] sm:$0xff]  }
 0x126   :  { %v160_v42 = vrot.slane %v159_v41, 1 }
 0x128   :  { %v161_v43 = vadd.f32 %v160_v42, %v159_v41  ;;  %v1469_v41 = vld [vmem:[#allocation2 + $0xc8] sm:$0xff]   ;;  %v1470_v42 = vld [vmem:[#allocation2 + $0xd0] sm:$0xff]  }
 0x12a   :  { %v162_v44 = vmul.f32 0.125, %v161_v43  ;;  %v1471_v43 = vld [vmem:[#allocation2 + $0xd8] sm:$0xff]  }
 0x12c   :  { %v163_v45 = vadd.f32 1e-05, %v162_v44  ;;  %v1472_v44 = vld [vmem:[#allocation2 + $0xe0] sm:$0xff]  }
 0x12e   :  { %1508 = vrsqrt.f32 %v163_v45  ;;  %v1473_v45 = vld [vmem:[#allocation2 + $0xe8] sm:$0xff]  }
 0x138   :  { %v1509_v48 = vpop.eup %1508 }
 0x139   :  { %v165_v49 = vmul.f32 %v1509_v48, %v1675_v22  ;;  %v1474_v48 = vld [vmem:[#allocation2 + $0xf0] sm:$0xff]  }
 0x13b   :  { %v169_v50 = vrot.slane %v165_v49, %v1680_v46  ;;  %v1475_v49 = vld [vmem:[#allocation2 + $0xf8] sm:$0xff]  }
 0x13d   :  { %v170_v52 = vmul.f32 %v169_v50, %v154_v36  ;;  %v1476_v50 = vld [vmem:[#allocation2 + $0x100] sm:$0xff]  }
 0x13f   :  { %v175_v53 = vadd.f32 %v174_v51, %v170_v52  ;;  %v1477_v51 = vld [vmem:[#allocation2 + $0x108] sm:$0xff]   ;;  %v1478_v52 = vld [vmem:[#allocation2 + $0x110] sm:$0xff]  }
 0x141   :  { %v176_v54 = vmul.f32 0.01, %v175_v53 }
 0x143   :  { %v177_v55 = vmax.f32 %v175_v53, %v176_v54  ;;  %v1479_v53 = vld [vmem:[#allocation2 + $0x118] sm:$0xff]   ;;  %v1480_v54 = vld [vmem:[#allocation2 + $0x120] sm:$0xff]  }
 0x145   :  { %v178_v56 = vpack.c.bf16 %v177_v55, %v177_v55  ;;  %v1481_v55 = vld [vmem:[#allocation2 + $0x128] sm:$0xff]  }
 0x147   :  { %1314 = vmatmul.mubr.bf16.vlgmr.msra.gmra.mrb[0].mxu1 %v178_v56  ;;  %v1482_v56 = vld [vmem:[#allocation2 + $0x130] sm:$0xff]  }
 0x148   :  { %1353 = vmatprep.mubr.msk.bf16.mxu1 %vm1600_vm0, %v1599_v0  ;;  %1338 = vmatpush3.bf16.msra.mxu1 %v1468_v40 }
 0x149   :  { %1339 = vmatprep.subr.bf16.mxu1 %v1599_v0 }
 0x14c   :  { %1340 = vmatpush3.bf16.msra.mxu1 %v1469_v41 }
 0x14d   :  { %1341 = vmatprep.subr.bf16.mxu1 %v1599_v0 }
 0x150   :  { %1342 = vmatpush3.bf16.msra.mxu1 %v1470_v42  ;;  %v1484_v42 = vld [vmem:[#allocation2 + $0x140] sm:$0xff]  }
 0x151   :  { %1343 = vmatprep.subr.bf16.mxu1 %v1599_v0 }
 0x154   :  { %1344 = vmatpush3.bf16.msra.mxu1 %v1471_v43  ;;  %v1485_v43 = vld [vmem:[#allocation2 + $0x148] sm:$0xff]  }
 0x155   :  { %1345 = vmatprep.subr.bf16.mxu1 %v1599_v0 }
 0x158   :  { %1346 = vmatpush3.bf16.msra.mxu1 %v1472_v44  ;;  %v1486_v44 = vld [vmem:[#allocation2 + $0x150] sm:$0xff]  }
 0x159   :  { %1347 = vmatprep.subr.bf16.mxu1 %v1599_v0 }
 0x15c   :  { %1348 = vmatpush3.bf16.msra.mxu1 %v1473_v45  ;;  %v1487_v45 = vld [vmem:[#allocation2 + $0x158] sm:$0xff]  }
 0x15d   :  { %1349 = vmatprep.subr.bf16.mxu1 %v1599_v0 }
 0x160   :  { %1350 = vmatpush3.bf16.msra.mxu1 %v1474_v48  ;;  %v1488_v48 = vld [vmem:[#allocation2 + $0x160] sm:$0xff]  }
 0x161   :  { %1351 = vmatprep.subr.bf16.mxu1 %v1599_v0 }
 0x164   :  { %1352 = vmatpush3.bf16.msra.mxu1 %v1475_v49  ;;  %v1489_v49 = vld [vmem:[#allocation2 + $0x168] sm:$0xff]  }
 0x165   :  { %1377 = vmatprep.subr.bf16.mxu1 %v1599_v0 }
 0x21a   :  { %v282_v4 = vpop.f32.mrb[0].mxu1 }
 0x21b   :  { %v283_v5 = vadd.f32 %v282_v4, %v199_v3  ;;  %v1315_v6 = vpop.f32.mrb[1].mxu1 }
 0x21c   :  { %v285_v7 = vpop.f32.mrb[2].mxu1 }
 0x21d   :  { %v288_v8 = vrot.slane %v283_v5, 4  ;;  %v1316_v9 = vpop.f32.mrb[3].mxu1 }
 0x21f   :  { %v289_v10 = vadd.f32 %v288_v8, %v283_v5 }
 0x221   :  { %v290_v11 = vrot.slane %v289_v10, 2 }
 0x223   :  { %v291_v12 = vadd.f32 %v290_v11, %v289_v10 }
 0x225   :  { %v292_v13 = vrot.slane %v291_v12, 1 }
 0x227   :  { %v293_v14 = vadd.f32 %v292_v13, %v291_v12 }
 0x229   :  { %v294_v15 = vmul.f32 0.125, %v293_v14 }
 0x22b   :  { %v295_v16 = vsub.f32 %v283_v5, %v294_v15 }
 0x22d   :  { %v296_v17 = vmul.f32 %v295_v16, %v295_v16 }
 0x22f   :  { %v297_v18 = vrot.slane %v296_v17, 4 }
 0x231   :  { %v298_v19 = vadd.f32 %v297_v18, %v296_v17 }
 0x233   :  { %v299_v23 = vrot.slane %v298_v19, 2 }
 0x235   :  { %v300_v24 = vadd.f32 %v299_v23, %v298_v19  ;;  %v450_v19 = vsub.s32 7, %v1667_v20  ;;  %v1503_v20 = vld [vmem:[#allocation2 + $0x1d8] sm:$0xff]  }
 0x237   :  { %v301_v25 = vrot.slane %v300_v24, 1 }
 0x239   :  { %v302_v26 = vadd.f32 %v301_v25, %v300_v24  ;;  %v1737_v24 = vld [vmem:[%s1824_s2 + $0x8] sm:$0xff] }
 0x23b   :  { %v303_v27 = vmul.f32 0.125, %v302_v26 }
 0x23d   :  { %v304_v28 = vadd.f32 1e-05, %v303_v27  ;;  %v456_v27 = vrot.slane %v1737_v24, %v1670_v21 }
 0x23f   :  { %1510 = vrsqrt.f32 %v304_v28 }
 0x249   :  { %v1511_v31 = vpop.eup %1510 }
 0x24a   :  { %v306_v32 = vmul.f32 %v1511_v31, %v1675_v22 }
 0x24c   :  { %v310_v33 = vrot.slane %v306_v32, %v309_v29 }
 0x24e   :  { %v311_v35 = vmul.f32 %v310_v33, %v295_v16 }
 0x250   :  { %v316_v36 = vadd.f32 %v315_v34, %v311_v35  ;;  %v1483_v35 = vld [vmem:[#allocation2 + $0x138] sm:$0xff]  }
 0x252   :  { %v317_v37 = vmul.f32 0.01, %v316_v36 }
 0x254   :  { %v318_v38 = vmax.f32 %v316_v36, %v317_v37 }
 0x256   :  { %v319_v39 = vpack.c.bf16 %v318_v38, %v318_v38 }
 0x258   :  { %1334 = vmatmul.mubr.bf16.vlgmr.msra.gmra.mrb[4].mxu0 %v319_v39 }
 0x259   :  { %1373 = vmatprep.mubr.msk.bf16.mxu0 %vm1600_vm0, %v1599_v0  ;;  %1358 = vmatpush3.bf16.msra.mxu0 %v1476_v50  ;;  %v1490_v50 = vld [vmem:[#allocation2 + $0x170] sm:$0xff]  }
 0x25a   :  { %1359 = vmatprep.subr.bf16.mxu0 %v1599_v0 }
 0x25d   :  { %1360 = vmatpush3.bf16.msra.mxu0 %v1477_v51  ;;  %v1491_v51 = vld [vmem:[#allocation2 + $0x178] sm:$0xff]  }
 0x25e   :  { %1361 = vmatprep.subr.bf16.mxu0 %v1599_v0 }
 0x261   :  { %1362 = vmatpush3.bf16.msra.mxu0 %v1478_v52  ;;  %v592_v52 = vrot.slane %v1737_v24, %v1683_v47 }
 0x262   :  { %1363 = vmatprep.subr.bf16.mxu0 %v1599_v0 }
 0x265   :  { %1364 = vmatpush3.bf16.msra.mxu0 %v1479_v53 }
 0x266   :  { %1365 = vmatprep.subr.bf16.mxu0 %v1599_v0 }
 0x269   :  { %1366 = vmatpush3.bf16.msra.mxu0 %v1480_v54 }
 0x26a   :  { %1367 = vmatprep.subr.bf16.mxu0 %v1599_v0 }
 0x26d   :  { %1368 = vmatpush3.bf16.msra.mxu0 %v1481_v55 }
 0x26e   :  { %1369 = vmatprep.subr.bf16.mxu0 %v1599_v0 }
 0x271   :  { %1370 = vmatpush3.bf16.msra.mxu0 %v1482_v56 }
 0x272   :  { %1371 = vmatprep.subr.bf16.mxu0 %v1599_v0 }
 0x275   :  { %1372 = vmatpush3.bf16.msra.mxu0 %v1483_v35  ;;  %v1498_v35 = vld [vmem:[#allocation2 + $0x1b0] sm:$0xff]  }
 0x276   :  { %1397 = vmatprep.subr.bf16.mxu0 %v1599_v0 }
 0x32b   :  { %v423_v59 = vpop.f32.mrb[4].mxu0 }
 0x32c   :  { %v424_v60 = vadd.f32 %v423_v59, %v340_v58  ;;  %v1335_v61 = vpop.f32.mrb[5].mxu0 }
 0x32d   :  { %v426_v62 = vpop.f32.mrb[6].mxu0 }
 0x32e   :  { %v429_v63 = vrot.slane %v424_v60, 4  ;;  %v1336_v1 = vpop.f32.mrb[7].mxu0 }
 0x330   :  { %v430_v3 = vadd.f32 %v429_v63, %v424_v60 }
 0x332   :  { %v431_v4 = vrot.slane %v430_v3, 2 }
 0x334   :  { %v432_v5 = vadd.f32 %v431_v4, %v430_v3 }
 0x336   :  { %v433_v6 = vrot.slane %v432_v5, 1 }
 0x338   :  { %v434_v7 = vadd.f32 %v433_v6, %v432_v5 }
 0x33a   :  { %v435_v8 = vmul.f32 0.125, %v434_v7 }
 0x33c   :  { %v436_v9 = vsub.f32 %v424_v60, %v435_v8 }
 0x33e   :  { %v437_v10 = vmul.f32 %v436_v9, %v436_v9 }
 0x340   :  { %v438_v11 = vrot.slane %v437_v10, 4 }
 0x342   :  { %v439_v12 = vadd.f32 %v438_v11, %v437_v10 }
 0x344   :  { %v440_v13 = vrot.slane %v439_v12, 2 }
 0x346   :  { %v441_v14 = vadd.f32 %v440_v13, %v439_v12 }
 0x348   :  { %v442_v15 = vrot.slane %v441_v14, 1 }
 0x34a   :  { %v443_v16 = vadd.f32 %v442_v15, %v441_v14 }
 0x34c   :  { %v444_v17 = vmul.f32 0.125, %v443_v16 }
 0x34e   :  { %v445_v18 = vadd.f32 1e-05, %v444_v17  ;;  %v708_v17 = vrot.slane %v1737_v24, %v309_v29  ;;  %v1495_v29 = vld [vmem:[#allocation2 + $0x198] sm:$0xff]  }
 0x350   :  { %1512 = vrsqrt.f32 %v445_v18 }
 0x35a   :  { %v1513_v23 = vpop.eup %1512 }
 0x35b   :  { %v447_v25 = vmul.f32 %v1513_v23, %v1675_v22  ;;  %v481_v22 = vrot.slane %v1737_v24, %v1680_v46 }
 0x35d   :  { %v451_v26 = vrot.slane %v447_v25, %v450_v19 }
 0x35f   :  { %v452_v28 = vmul.f32 %v451_v26, %v436_v9 }
 0x361   :  { %v457_v31 = vadd.f32 %v456_v27, %v452_v28  ;;  %v1492_v28 = vld [vmem:[#allocation2 + $0x180] sm:$0xff]  }
 0x363   :  { %v458_v32 = vmul.f32 0.01, %v457_v31 }
 0x365   :  { %v459_v33 = vmax.f32 %v457_v31, %v458_v32  ;;  %v1493_v31 = vld [vmem:[#allocation2 + $0x188] sm:$0xff]   ;;  %v1494_v32 = vld [vmem:[#allocation2 + $0x190] sm:$0xff]  }
 0x367   :  { %v460_v34 = vpack.c.bf16 %v459_v33, %v459_v33  ;;  %v1496_v33 = vld [vmem:[#allocation2 + $0x1a0] sm:$0xff]  }
 0x369   :  { %1354 = vmatmul.mubr.bf16.vlgmr.msra.gmra.mrb[4].mxu1 %v460_v34  ;;  %v1497_v34 = vld [vmem:[#allocation2 + $0x1a8] sm:$0xff]  }
 0x36a   :  { %1393 = vmatprep.mubr.msk.bf16.mxu1 %vm1600_vm0, %v1599_v0  ;;  %1378 = vmatpush3.bf16.msra.mxu1 %v1484_v42 }
 0x36b   :  { %1379 = vmatprep.subr.bf16.mxu1 %v1599_v0 }
 0x36e   :  { %1380 = vmatpush3.bf16.msra.mxu1 %v1485_v43 }
 0x36f   :  { %1381 = vmatprep.subr.bf16.mxu1 %v1599_v0 }
 0x372   :  { %1382 = vmatpush3.bf16.msra.mxu1 %v1486_v44 }
 0x373   :  { %1383 = vmatprep.subr.bf16.mxu1 %v1599_v0 }
 0x376   :  { %1384 = vmatpush3.bf16.msra.mxu1 %v1487_v45 }
 0x377   :  { %1385 = vmatprep.subr.bf16.mxu1 %v1599_v0 }
 0x37a   :  { %1386 = vmatpush3.bf16.msra.mxu1 %v1488_v48 }
 0x37b   :  { %1387 = vmatprep.subr.bf16.mxu1 %v1599_v0 }
 0x37e   :  { %1388 = vmatpush3.bf16.msra.mxu1 %v1489_v49 }
 0x37f   :  { %1389 = vmatprep.subr.bf16.mxu1 %v1599_v0 }
 0x382   :  { %1390 = vmatpush3.bf16.msra.mxu1 %v1490_v50 }
 0x383   :  { %1391 = vmatprep.subr.bf16.mxu1 %v1599_v0 }
 0x386   :  { %1392 = vmatpush3.bf16.msra.mxu1 %v1491_v51 }
 0x387   :  { %1417 = vmatprep.subr.bf16.mxu1 %v1599_v0 }
 0x43c   :  { %v564_v36 = vpop.f32.mrb[4].mxu1 }
 0x43d   :  { %v565_v37 = vadd.f32 %v564_v36, %v481_v22  ;;  %v1355_v38 = vpop.f32.mrb[5].mxu1  ;;  %v1499_v22 = vld [vmem:[#allocation2 + $0x1b8] sm:$0xff]   ;;  %v733_v36 = vrot.slane %v1737_v24, %v314_v30 }
 0x43e   :  { %v567_v39 = vpop.f32.mrb[6].mxu1 }
 0x43f   :  { %v571_v40 = vpack.c.bf16 %v565_v37, %v565_v37  ;;  %570 = vst [vmem:[#allocation6] sm:$0xff] %v565_v37  ;;  %v1356_v41 = vpop.f32.mrb[7].mxu1 }
 0x441   :  { %1374 = vmatmul.mubr.bf16.vlgmr.msra.gmra.mrb[8].mxu0 %v571_v40 }
 0x442   :  { %1413 = vmatprep.mubr.msk.bf16.mxu0 %vm1600_vm0, %v1599_v0  ;;  %1398 = vmatpush3.bf16.msra.mxu0 %v1492_v28 }
 0x443   :  { %1399 = vmatprep.subr.bf16.mxu0 %v1599_v0 }
 0x446   :  { %1400 = vmatpush3.bf16.msra.mxu0 %v1493_v31 }
 0x447   :  { %1401 = vmatprep.subr.bf16.mxu0 %v1599_v0 }
 0x44a   :  { %1402 = vmatpush3.bf16.msra.mxu0 %v1494_v32 }
 0x44b   :  { %1403 = vmatprep.subr.bf16.mxu0 %v1599_v0 }
 0x44e   :  { %1404 = vmatpush3.bf16.msra.mxu0 %v1495_v29 }
 0x44f   :  { %1405 = vmatprep.subr.bf16.mxu0 %v1599_v0 }
 0x452   :  { %1406 = vmatpush3.bf16.msra.mxu0 %v1496_v33 }
 0x453   :  { %1407 = vmatprep.subr.bf16.mxu0 %v1599_v0 }
 0x456   :  { %1408 = vmatpush3.bf16.msra.mxu0 %v1497_v34 }
 0x457   :  { %1409 = vmatprep.subr.bf16.mxu0 %v1599_v0 }
 0x45a   :  { %1410 = vmatpush3.bf16.msra.mxu0 %v1498_v35 }
 0x45b   :  { %1411 = vmatprep.subr.bf16.mxu0 %v1599_v0 }
 0x45e   :  { %1412 = vmatpush3.bf16.msra.mxu0 %v1499_v22 }
 0x514   :  { %v675_v53 = vpop.f32.mrb[8].mxu0 }
 0x515   :  { %v676_v54 = vadd.f32 %v675_v53, %v592_v52  ;;  %v1375_v55 = vpop.f32.mrb[9].mxu0 }
 0x516   :  { %v678_v56 = vpop.f32.mrb[10].mxu0 }
 0x517   :  { %v681_v58 = vrot.slane %v676_v54, 4  ;;  %v1376_v59 = vpop.f32.mrb[11].mxu0 }
 0x519   :  { %v682_v60 = vadd.f32 %v681_v58, %v676_v54 }
 0x51b   :  { %v683_v61 = vrot.slane %v682_v60, 2 }
 0x51d   :  { %v684_v62 = vadd.f32 %v683_v61, %v682_v60 }
 0x51f   :  { %v685_v63 = vrot.slane %v684_v62, 1 }
 0x521   :  { %v686_v1 = vadd.f32 %v685_v63, %v684_v62 }
 0x523   :  { %v687_v3 = vmul.f32 0.125, %v686_v1  ;;  %v849_v1 = vrot.slane %v1737_v24, %v450_v19  ;;  %v1505_v19 = vld [vmem:[#allocation2 + $0x1e8] sm:$0xff]  }
 0x525   :  { %v688_v4 = vsub.f32 %v676_v54, %v687_v3 }
 0x527   :  { %v689_v5 = vmul.f32 %v688_v4, %v688_v4 }
 0x529   :  { %v690_v6 = vrot.slane %v689_v5, 4 }
 0x52b   :  { %v691_v7 = vadd.f32 %v690_v6, %v689_v5 }
 0x52d   :  { %v692_v8 = vrot.slane %v691_v7, 2 }
 0x52f   :  { %v693_v9 = vadd.f32 %v692_v8, %v691_v7  ;;  %v1500_v8 = vld [vmem:[#allocation2 + $0x1c0] sm:$0xff]  }
 0x531   :  { %v694_v10 = vrot.slane %v693_v9, 1 }
 0x533   :  { %v695_v11 = vadd.f32 %v694_v10, %v693_v9  ;;  %v1501_v9 = vld [vmem:[#allocation2 + $0x1c8] sm:$0xff]   ;;  %v1502_v10 = vld [vmem:[#allocation2 + $0x1d0] sm:$0xff]  }
 0x535   :  { %v696_v12 = vmul.f32 0.125, %v695_v11  ;;  %v1507_v11 = vld [vmem:[#allocation2 + $0x1f8] sm:$0xff]  }
 0x537   :  { %v697_v13 = vadd.f32 1e-05, %v696_v12  ;;  %v36_v12 = vld [vmem:[%s1824_s2 + $0x10] sm:$0xff]  ;;  %s1601_s2 = smov [#allocation6]  }
 0x538   :  { %s1127_s9 = sshll.u32 %s1601_s2, 4  ;;  %s1128_s9 = int_to_ptr.vmem [resolvable:$true] %s1127_s9 }
 0x539   :  { %1514 = vrsqrt.f32 %v697_v13  ;;  %v874_v13 = vrot.slane %v36_v12, %v1670_v21  ;;  %s1546_s10 = scalar_lea.vmem %s1128_s9, 128  ;;  %p1551_p9 = scmp.lt.s32.totalorder %s1128_s9, %s1128_s9 }
 0x53a   :  { %p1547_p8 = scmp.ne.s32.totalorder %s1128_s9, %s1546_s10  ;;  %p1552_p10 = scmp.lt.s32.totalorder %s1546_s10, %s1546_s10 }
 0x53c   :  { %p1553_p11 = por %p1552_p10, %p1551_p9 }
 0x53e   :  { %p1554_p12 = pnand %p1553_p11, %p1547_p8 }
 0x543   :  { %v1515_v14 = vpop.eup %1514 }
 0x544   :  { %v699_v15 = vmul.f32 %v1515_v14, %v1737_v24 }
 0x546   :  { %v703_v16 = vrot.slane %v699_v15, %v1700_v2 }
 0x548   :  { %v704_v18 = vmul.f32 %v703_v16, %v688_v4 }
 0x54a   :  { %v709_v23 = vadd.f32 %v708_v17, %v704_v18 }
 0x54c   :  { %v710_v25 = vmul.f32 0.01, %v709_v23 }
 0x54e   :  { %v711_v26 = vmax.f32 %v709_v23, %v710_v25 }
 0x550   :  { %v712_v27 = vpack.c.bf16 %v711_v26, %v711_v26 }
 0x552   :  { %1394 = vmatmul.mubr.bf16.vlgmr.msra.gmra.mrb[8].mxu1 %v712_v27 }
 0x553   :  { %1433 = vmatprep.mubr.msk.bf16.mxu1 %vm1600_vm0, %v1599_v0  ;;  %1418 = vmatpush3.bf16.msra.mxu1 %v1500_v8 }
 0x554   :  { %1419 = vmatprep.subr.bf16.mxu1 %v1599_v0 }
 0x557   :  { %1420 = vmatpush3.bf16.msra.mxu1 %v1501_v9 }
 0x558   :  { %1421 = vmatprep.subr.bf16.mxu1 %v1599_v0 }
 0x55b   :  { %1422 = vmatpush3.bf16.msra.mxu1 %v1502_v10 }
 0x55c   :  { %1423 = vmatprep.subr.bf16.mxu1 %v1599_v0 }
 0x55f   :  { %1424 = vmatpush3.bf16.msra.mxu1 %v1503_v20 }
 0x560   :  { %1425 = vmatprep.subr.bf16.mxu1 %v1599_v0 }
 0x625   :  { %v816_v37 = vpop.f32.mrb[8].mxu1 }
 0x626   :  { %v817_v38 = vadd.f32 %v816_v37, %v733_v36  ;;  %v1395_v39 = vpop.f32.mrb[9].mxu1 }
 0x627   :  { %v819_v40 = vpop.f32.mrb[10].mxu1 }
 0x628   :  { %v822_v41 = vrot.slane %v817_v38, 4  ;;  %v1396_v42 = vpop.f32.mrb[11].mxu1 }
 0x629   :  { %v990_v42 = vrot.slane %v36_v12, %v1683_v47 }
 0x62a   :  { %v823_v43 = vadd.f32 %v822_v41, %v817_v38 }
 0x62c   :  { %v824_v44 = vrot.slane %v823_v43, 2 }
 0x62e   :  { %v825_v45 = vadd.f32 %v824_v44, %v823_v43 }
 0x630   :  { %v826_v48 = vrot.slane %v825_v45, 1 }
 0x632   :  { %v827_v49 = vadd.f32 %v826_v48, %v825_v45 }
 0x634   :  { %v828_v50 = vmul.f32 0.125, %v827_v49 }
 0x636   :  { %v829_v51 = vsub.f32 %v817_v38, %v828_v50 }
 0x638   :  { %v830_v52 = vmul.f32 %v829_v51, %v829_v51 }
 0x63a   :  { %v831_v53 = vrot.slane %v830_v52, 4 }
 0x63c   :  { %v832_v54 = vadd.f32 %v831_v53, %v830_v52 }
 0x63e   :  { %v833_v55 = vrot.slane %v832_v54, 2 }
 0x640   :  { %v834_v56 = vadd.f32 %v833_v55, %v832_v54 }
 0x642   :  { %v835_v58 = vrot.slane %v834_v56, 1 }
 0x644   :  { %v836_v30 = vadd.f32 %v835_v58, %v834_v56 }
 0x646   :  { %v837_v59 = vmul.f32 0.125, %v836_v30 }
 0x648   :  { %v838_v60 = vadd.f32 1e-05, %v837_v59 }
 0x64a   :  { %1516 = vrsqrt.f32 %v838_v60 }
 0x654   :  { %v1517_v61 = vpop.eup %1516 }
 0x655   :  { %v840_v62 = vmul.f32 %v1517_v61, %v1737_v24  ;;  %v1506_v24 = vld [vmem:[#allocation2 + $0x1f0] sm:$0xff]  }
 0x657   :  { %v844_v63 = vrot.slane %v840_v62, %v339_v57  ;;  %v1504_v57 = vld [vmem:[#allocation2 + $0x1e0] sm:$0xff]  }
 0x658   :  { %1426 = vmatpush3.bf16.msra.mxu1 %v1504_v57 }
 0x659   :  { %v845_v3 = vmul.f32 %v844_v63, %v829_v51  ;;  %1427 = vmatprep.subr.bf16.mxu1 %v1599_v0 }
 0x65b   :  { %v850_v4 = vadd.f32 %v849_v1, %v845_v3 }
 0x65c   :  { %1428 = vmatpush3.bf16.msra.mxu1 %v1505_v19 }
 0x65d   :  { %v851_v5 = vmul.f32 0.01, %v850_v4  ;;  %1429 = vmatprep.subr.bf16.mxu1 %v1599_v0 }
 0x65f   :  { %v852_v6 = vmax.f32 %v850_v4, %v851_v5 }
 0x660   :  { %1430 = vmatpush3.bf16.msra.mxu1 %v1506_v24 }
 0x661   :  { %v853_v7 = vpack.c.bf16 %v852_v6, %v852_v6  ;;  %1431 = vmatprep.subr.bf16.mxu1 %v1599_v0 }
 0x663   :  { %1414 = vmatmul.mubr.bf16.vlgmr.msra.gmra.mrb[12].mxu0 %v853_v7 }
 0x664   :  { %1432 = vmatpush3.bf16.msra.mxu1 %v1507_v11 }
 0x736   :  { %v957_v14 = vpop.f32.mrb[12].mxu0 }
 0x737   :  { %v958_v15 = vadd.f32 %v957_v14, %v874_v13  ;;  %v1415_v16 = vpop.f32.mrb[13].mxu0 }
 0x738   :  { %v960_v17 = vpop.f32.mrb[14].mxu0 }
 0x739   :  { %v963_v18 = vrot.slane %v958_v15, 4  ;;  %v1416_v23 = vpop.f32.mrb[15].mxu0 }
 0x73b   :  { %v964_v25 = vadd.f32 %v963_v18, %v958_v15 }
 0x73d   :  { %v965_v26 = vrot.slane %v964_v25, 2 }
 0x73f   :  { %v966_v27 = vadd.f32 %v965_v26, %v964_v25 }
 0x741   :  { %v967_v28 = vrot.slane %v966_v27, 1 }
 0x743   :  { %v968_v31 = vadd.f32 %v967_v28, %v966_v27 }
 0x745   :  { %v969_v32 = vmul.f32 0.125, %v968_v31 }
 0x747   :  { %v970_v0 = vsub.f32 %v958_v15, %v969_v32 }
 0x749   :  { %v971_v29 = vmul.f32 %v970_v0, %v970_v0 }
 0x74b   :  { %v972_v33 = vrot.slane %v971_v29, 4 }
 0x74d   :  { %v973_v34 = vadd.f32 %v972_v33, %v971_v29 }
 0x74f   :  { %v974_v35 = vrot.slane %v973_v34, 2 }
 0x751   :  { %v975_v22 = vadd.f32 %v974_v35, %v973_v34 }
 0x753   :  { %v976_v36 = vrot.slane %v975_v22, 1 }
 0x755   :  { %v977_v21 = vadd.f32 %v976_v36, %v975_v22 }
 0x757   :  { %v978_v37 = vmul.f32 0.125, %v977_v21 }
 0x759   :  { %v979_v38 = vadd.f32 1e-05, %v978_v37 }
 0x75b   :  { %1518 = vrsqrt.f32 %v979_v38 }
 0x765   :  { %v1519_v39 = vpop.eup %1518 }
 0x766   :  { %v981_v40 = vmul.f32 %v1519_v39, %v36_v12 }
 0x768   :  { %v985_v41 = vrot.slane %v981_v40, %v1680_v46 }
 0x76a   :  { %v986_v43 = vmul.f32 %v985_v41, %v970_v0 }
 0x76c   :  { %v991_v44 = vadd.f32 %v990_v42, %v986_v43 }
 0x76e   :  { %v992_v45 = vmul.f32 0.01, %v991_v44 }
 0x770   :  { %v993_v48 = vmax.f32 %v991_v44, %v992_v45 }
 0x772   :  { %v994_v49 = vpack.c.bf16 %v993_v48, %v993_v48 }
 0x774   :  { %1434 = vmatmul.mubr.bf16.vlgmr.msra.gmra.mrb[12].mxu1 %v994_v49 }
 0x775   :  { %1557 = shalt.err (!%p1554_p12)
}
 0x776   :  { %s1558_s13 = scalar_lea.hbm %s1826_s4, 128 }
 0x777   :  { %p1559_p13 = scmp.ne.s32.totalorder %s1826_s4, %s1558_s13  ;;  %p1562_p0 = scmp.lt.u32.totalorder %s1558_s13, %s1826_s4 }
 0x779   :  { %p1564_p1 = pnand %p1562_p0, %p1559_p13 }
 0x77b   :  { %1567 = shalt.err (!%p1564_p1)
}
 0x77c   :  { %1130 = dma.vmem_to_hbm [thread:$0]  %s1128_s9, 128, %s1826_s4, [#allocation7]   ;;  %v1015_v46 = vrot.slane %v36_v12, %v1700_v2 }
 0x77d   :  { %s1602_s20 = smov [#allocation5]  }
 0x77e   :  { %s1117_s21 = sshll.u32 %s1602_s20, 4  ;;  %s1118_s21 = int_to_ptr.vmem [resolvable:$true] %s1117_s21 }
 0x77f   :  { %s1568_s22 = scalar_lea.vmem %s1118_s21, 128  ;;  %p1573_p3 = scmp.lt.s32.totalorder %s1118_s21, %s1118_s21 }
 0x780   :  { %p1569_p2 = scmp.ne.s32.totalorder %s1118_s21, %s1568_s22  ;;  %p1574_p4 = scmp.lt.s32.totalorder %s1568_s22, %s1568_s22 }
 0x782   :  { %p1575_p5 = por %p1574_p4, %p1573_p3 }
 0x784   :  { %p1576_p6 = pnand %p1575_p5, %p1569_p2 }
 0x847   :  { %v1098_v47 = vpop.f32.mrb[12].mxu1 }
 0x848   :  { %v1099_v50 = vadd.f32 %v1098_v47, %v1015_v46  ;;  %v1435_v51 = vpop.f32.mrb[13].mxu1 }
 0x849   :  { %v1101_v52 = vpop.f32.mrb[14].mxu1 }
 0x84a   :  { %v1204_v53 = vmul.f32 -1.442695, %v1099_v50  ;;  %v1436_v54 = vpop.f32.mrb[15].mxu1 }
 0x84c   :  { %1520 = vpow2.f32 %v1204_v53 }
 0x856   :  { %v1521_v55 = vpop.eup %1520 }
 0x857   :  { %v1107_v56 = vadd.f32 1.0, %v1521_v55 }
 0x859   :  { %1522 = vrcp.f32 %v1107_v56 }
 0x863   :  { %v1523_v58 = vpop.eup %1522 }
 0x864   :  { %1110 = vst [vmem:[#allocation5] sm:$0xff] %v1523_v58 }
 0x865   :  { %1579 = shalt.err (!%p1576_p6)
}
 0x866   :  { %s1580_s24 = scalar_lea.hbm %s1825_s3, 128 }
 0x867   :  { %p1581_p7 = scmp.ne.s32.totalorder %s1825_s3, %s1580_s24  ;;  %p1584_p8 = scmp.lt.u32.totalorder %s1580_s24, %s1825_s3 }
 0x869   :  { %p1586_p9 = pnand %p1584_p8, %p1581_p7 }
 0x86b   :  { %1589 = shalt.err (!%p1586_p9)
}
 0x86c   :  { %1120 = dma.vmem_to_hbm [thread:$0]  %s1118_s21, 128, %s1825_s3, [#allocation4]  }
 0x86d   :  { %1592 = dma.done.wait [#allocation4], 128  }
 0x86e   :  { %1593 = vsyncadd [#allocation4], 4294967168 }
 0x86f   :  { %1594 = dma.done.wait [#allocation7], 128  }
 0x870   :  { %1595 = vsyncadd [#allocation7], 4294967168 }
 0x871   :  { %1137 = vsyncpa [#allocation3], 1 }
 0x872   :  { %1138 = vsyncpa [#allocation4], 1 }
 0x873   :  { %1139 = vsyncpa [#allocation7], 1 }

</bundles_post_ra>
